<compile_context>
chip_gen: v5e
topology: v5e:2x2
jax: 0.10.0
libtpu: 0.0.40
codegen_flags: <defaults>
</compile_context>

<pallas_src>
import functools

import jax
import jax.numpy as jnp
from jax.experimental import pallas as pl
from jax.experimental.pallas import tpu as pltpu


def _round_up(x, m):
    return ((x + m - 1) // m) * m


def _choose_tiles(R, HW, itemsize):
    """Pick (tm, tk): (8,128)-aligned tiles for a cdiv grid over (R, HW)."""
    tm = min(_round_up(R, 8), 512)

    def shrink(tm, min_blocks, floor):
        # Halve tm (staying a multiple of 8) until the parallel row axis has
        # enough blocks; never go below `floor`.
        while tm > floor and pl.cdiv(R, tm) < min_blocks:
            tm = max(floor, _round_up(tm // 2, 8))
        return tm

    # v7x megacore: the row axis is the only "parallel" axis -> need >= 2 row
    # blocks (2 TensorCores), prefer >= 4 for load balance while tiles stay big.
    tm = shrink(tm, 4, 128)
    tm = shrink(tm, 2, 8)

    # Reduction tile: dtype-aware cap targeting ~16 MiB of input per grid step
    # (2 inputs x tm x tk x itemsize); bf16 halves the footprint so cap doubles.
    tk_cap = 4096 if itemsize >= 4 else 8192
    tk = min(_round_up(HW, 128), tk_cap)
    return tm, tk


def _complex_gap_kernel(xr_ref, xi_ref, or_ref, oi_ref, accr_ref, acci_ref, *,
                        hw, tk, inv_n, need_mask):
    k = pl.program_id(1)

    @pl.when(k == 0)
    def _():
        accr_ref[...] = jnp.zeros_like(accr_ref)
        acci_ref[...] = jnp.zeros_like(acci_ref)

    # Fold the tk reduction lanes into 128-lane-wide f32 partial accumulators
    # using only lane-aligned chunk loads + VPU adds (no per-step XLU reduce).
    pr = accr_ref[...]
    pi = acci_ref[...]
    for c in range(tk // 128):
        xr = xr_ref[:, c * 128:(c + 1) * 128].astype(jnp.float32)
        xi = xi_ref[:, c * 128:(c + 1) * 128].astype(jnp.float32)
        if need_mask:
            # Zero out padded reduction columns (only present in the last k block
            # of a cdiv grid when HW is not a multiple of tk/128).
            col = (k * tk + c * 128
                   + jax.lax.broadcasted_iota(jnp.int32, xr.shape, 1))
            valid = col < hw
            xr = jnp.where(valid, xr, 0.0)
            xi = jnp.where(valid, xi, 0.0)
        pr = pr + xr
        pi = pi + xi
    accr_ref[...] = pr
    acci_ref[...] = pi

    @pl.when(k == pl.num_programs(1) - 1)
    def _():
        # Single cross-lane reduce + scale in the epilogue.
        or_ref[...] = (jnp.sum(accr_ref[...], axis=-1, keepdims=True)
                       * inv_n).astype(or_ref.dtype)
        oi_ref[...] = (jnp.sum(acci_ref[...], axis=-1, keepdims=True)
                       * inv_n).astype(oi_ref.dtype)


def complex_adaptive_avg_pool2d(input_r, input_i, output_size=(1, 1)):
    """input_r, input_i: (B, C, H, W) -> ((B, C, 1, 1), (B, C, 1, 1))."""
    if tuple(output_size) != (1, 1):
        # TODO(synk): general adaptive output sizes; only the module default
        # output_size=[1, 1] (global average pooling) is implemented here.
        raise NotImplementedError("only output_size=(1, 1) is supported")
    assert input_r.shape == input_i.shape, "real/imag shapes must match"

    B, C, H, W = input_r.shape
    R, HW = B * C, H * W
    itemsize = jnp.dtype(input_r.dtype).itemsize

    # Contiguous reshapes: no extra HBM traffic.
    xr2 = input_r.reshape(R, HW)
    xi2 = input_i.reshape(R, HW)

    tm, tk = _choose_tiles(R, HW, itemsize)
    num_i = pl.cdiv(R, tm)
    num_k = pl.cdiv(HW, tk)
    need_mask = (HW % tk) != 0
    inv_n = 1.0 / float(HW)
    R_pad = num_i * tm  # padded output rows; extras dropped below (negligible bytes)

    # Explicit scoped-VMEM limit: 2 inputs x 2 buffers x tile + accumulators,
    # clamped to <= 48 MiB so it always fits v7x's 64 MiB physical VMEM.
    in_buf_bytes = 2 * 2 * tm * tk * itemsize
    acc_bytes = 2 * tm * 128 * 4
    out_buf_bytes = 2 * 2 * tm * itemsize
    vmem_limit = min(48 << 20,
                     max(32 << 20, in_buf_bytes + acc_bytes + out_buf_bytes + (4 << 20)))

    cost = pl.CostEstimate(
        flops=2 * R * HW,                      # one add per element, real + imag
        transcendentals=0,
        bytes_accessed=2 * R * HW * itemsize + 2 * R * itemsize)

    in_spec = pl.BlockSpec((tm, tk), lambda i, k: (i, k))
    out_spec = pl.BlockSpec((tm, 1), lambda i, k: (i, 0))

    out_r2, out_i2 = pl.pallas_call(
        functools.partial(_complex_gap_kernel, hw=HW, tk=tk, inv_n=inv_n,
                          need_mask=need_mask),
        out_shape=(jax.ShapeDtypeStruct((R_pad, 1), input_r.dtype),
                   jax.ShapeDtypeStruct((R_pad, 1), input_i.dtype)),
        grid_spec=pltpu.PrefetchScalarGridSpec(
            num_scalar_prefetch=0,
            grid=(num_i, num_k),
            in_specs=[in_spec, in_spec],
            out_specs=[out_spec, out_spec],
            scratch_shapes=[pltpu.VMEM((tm, 128), jnp.float32),
                            pltpu.VMEM((tm, 128), jnp.float32)],
        ),
        compiler_params=pltpu.CompilerParams(
            dimension_semantics=("parallel", "arbitrary"),
            vmem_limit_bytes=vmem_limit),
        cost_estimate=cost,
    )(xr2, xi2)

    out_r = out_r2[:R].reshape(B, C, 1, 1)
    out_i = out_i2[:R].reshape(B, C, 1, 1)
    return out_r, out_i


class Complex_AdaptiveAvgPool2d:
    """Mirror of the PyTorch module's forward(input_r, input_i)."""

    def __init__(self, output_size=(1, 1)):
        self.output_size = tuple(output_size)

    def __call__(self, input_r, input_i):
        return complex_adaptive_avg_pool2d(input_r, input_i, self.output_size)


if __name__ == "__main__":
    key = jax.random.PRNGKey(0)
    k_r, k_i = jax.random.split(key, 2)

    B, C, H, W = 2, 4, 16, 16
    x_r = jax.random.normal(k_r, (B, C, H, W), dtype=jnp.float32)
    x_i = jax.random.normal(k_i, (B, C, H, W), dtype=jnp.float32)

    pool = Complex_AdaptiveAvgPool2d(output_size=[1, 1])
    out_r, out_i = pool(x_r, x_i)
    jax.block_until_ready((out_r, out_i))

    # Pure-JAX reference (adaptive_avg_pool2d with output_size [1,1] == global mean).
    ref_r = jnp.mean(x_r, axis=(2, 3), keepdims=True)
    ref_i = jnp.mean(x_i, axis=(2, 3), keepdims=True)
    assert out_r.shape == (B, C, 1, 1) and out_i.shape == (B, C, 1, 1)
    assert jnp.allclose(out_r, ref_r, atol=1e-5, rtol=1e-5), "real part mismatch"
    assert jnp.allclose(out_i, ref_i, atol=1e-5, rtol=1e-5), "imag part mismatch"

    print("KERNEL_OK")
</pallas_src>

<mosaic_0001>
module attributes {stable_mosaic.version = 11 : i64} {
  func.func @_complex_gap_kernel(%arg0: i32, %arg1: i32, %arg2: memref<8x256xf32, #tpu.memory_space<vmem>>, %arg3: memref<8x256xf32, #tpu.memory_space<vmem>>, %arg4: memref<8x1xf32, #tpu.memory_space<vmem>>, %arg5: memref<8x1xf32, #tpu.memory_space<vmem>>, %arg6: memref<8x128xf32, #tpu.memory_space<vmem>>, %arg7: memref<8x128xf32, #tpu.memory_space<vmem>>) attributes {dimension_semantics = [#tpu.dimension_semantics<parallel>, #tpu.dimension_semantics<arbitrary>], iteration_bounds = array<i64: 1, 1>, scalar_prefetch = 0 : i64, scratch_operands = 2 : i64, tpu.core_type = #tpu.core_type<tc>, window_params = [{transform_indices = @transform_0, window_bounds = array<i64: 8, 256>}, {transform_indices = @transform_1, window_bounds = array<i64: 8, 256>}, {transform_indices = @transform_2, window_bounds = array<i64: 8, 1>}, {transform_indices = @transform_3, window_bounds = array<i64: 8, 1>}]} {
    %c0_i32 = arith.constant 0 : i32
    %0 = arith.cmpi eq, %arg1, %c0_i32 : i32
    %1 = arith.extui %0 : i1 to i32
    %c0_i32_0 = arith.constant 0 : i32
    %2 = arith.cmpi ne, %1, %c0_i32_0 : i32
    scf.if %2 {
      %cst = arith.constant 0.000000e+00 : f32
      %18 = vector.broadcast %cst : f32 to vector<8x128xf32>
      %c0_17 = arith.constant 0 : index
      %c0_18 = arith.constant 0 : index
      %19 = vector.load %arg6[%c0_17, %c0_18] : memref<8x128xf32, #tpu.memory_space<vmem>>, vector<8x128xf32>
      tpu.vector_store %arg6[%c0_17, %c0_18], %18 {strides = array<i32>} : memref<8x128xf32, #tpu.memory_space<vmem>>, vector<8x128xf32>,
      %cst_19 = arith.constant 0.000000e+00 : f32
      %20 = vector.broadcast %cst_19 : f32 to vector<8x128xf32>
      %c0_20 = arith.constant 0 : index
      %c0_21 = arith.constant 0 : index
      %21 = vector.load %arg7[%c0_20, %c0_21] : memref<8x128xf32, #tpu.memory_space<vmem>>, vector<8x128xf32>
      tpu.vector_store %arg7[%c0_20, %c0_21], %20 {strides = array<i32>} : memref<8x128xf32, #tpu.memory_space<vmem>>, vector<8x128xf32>,
    } else {
    }
    %c0 = arith.constant 0 : index
    %c0_1 = arith.constant 0 : index
    %3 = vector.load %arg6[%c0, %c0_1] : memref<8x128xf32, #tpu.memory_space<vmem>>, vector<8x128xf32>
    %c0_2 = arith.constant 0 : index
    %c0_3 = arith.constant 0 : index
    %4 = vector.load %arg7[%c0_2, %c0_3] : memref<8x128xf32, #tpu.memory_space<vmem>>, vector<8x128xf32>
    %c0_4 = arith.constant 0 : index
    %c0_5 = arith.constant 0 : index
    %5 = vector.load %arg2[%c0_4, %c0_5] : memref<8x256xf32, #tpu.memory_space<vmem>>, vector<8x128xf32>
    %c0_6 = arith.constant 0 : index
    %c0_7 = arith.constant 0 : index
    %6 = vector.load %arg3[%c0_6, %c0_7] : memref<8x256xf32, #tpu.memory_space<vmem>>, vector<8x128xf32>
    %7 = arith.addf %3, %5 : vector<8x128xf32>
    %8 = arith.addf %4, %6 : vector<8x128xf32>
    %c0_8 = arith.constant 0 : index
    %c128 = arith.constant 128 : index
    %9 = vector.load %arg2[%c0_8, %c128] : memref<8x256xf32, #tpu.memory_space<vmem>>, vector<8x128xf32>
    %c0_9 = arith.constant 0 : index
    %c128_10 = arith.constant 128 : index
    %10 = vector.load %arg3[%c0_9, %c128_10] : memref<8x256xf32, #tpu.memory_space<vmem>>, vector<8x128xf32>
    %11 = arith.addf %7, %9 : vector<8x128xf32>
    %12 = arith.addf %8, %10 : vector<8x128xf32>
    %c0_11 = arith.constant 0 : index
    %c0_12 = arith.constant 0 : index
    %13 = vector.load %arg6[%c0_11, %c0_12] : memref<8x128xf32, #tpu.memory_space<vmem>>, vector<8x128xf32>
    tpu.vector_store %arg6[%c0_11, %c0_12], %11 {strides = array<i32>} : memref<8x128xf32, #tpu.memory_space<vmem>>, vector<8x128xf32>,
    %c0_13 = arith.constant 0 : index
    %c0_14 = arith.constant 0 : index
    %14 = vector.load %arg7[%c0_13, %c0_14] : memref<8x128xf32, #tpu.memory_space<vmem>>, vector<8x128xf32>
    tpu.vector_store %arg7[%c0_13, %c0_14], %12 {strides = array<i32>} : memref<8x128xf32, #tpu.memory_space<vmem>>, vector<8x128xf32>,
    %c0_i32_15 = arith.constant 0 : i32
    %15 = arith.cmpi eq, %arg1, %c0_i32_15 : i32
    %16 = arith.extui %15 : i1 to i32
    %c0_i32_16 = arith.constant 0 : i32
    %17 = arith.cmpi ne, %16, %c0_i32_16 : i32
    scf.if %17 {
      %c0_17 = arith.constant 0 : index
      %c0_18 = arith.constant 0 : index
      %18 = vector.load %arg6[%c0_17, %c0_18] : memref<8x128xf32, #tpu.memory_space<vmem>>, vector<8x128xf32>
      %cst = arith.constant dense<0.000000e+00> : vector<8xf32>
      %19 = vector.multi_reduction <add>, %18, %cst [1] : vector<8x128xf32> to vector<8xf32>
      %20 = vector.shape_cast %19 : vector<8xf32> to vector<8x1xf32>
      %cst_19 = arith.constant 3.906250e-03 : f32
      %21 = vector.broadcast %cst_19 : f32 to vector<8x1xf32>
      %22 = arith.mulf %20, %21 : vector<8x1xf32>
      %c0_20 = arith.constant 0 : index
      %c0_21 = arith.constant 0 : index
      %23 = vector.load %arg4[%c0_20, %c0_21] : memref<8x1xf32, #tpu.memory_space<vmem>>, vector<8x1xf32>
      tpu.vector_store %arg4[%c0_20, %c0_21], %22 {strides = array<i32>} : memref<8x1xf32, #tpu.memory_space<vmem>>, vector<8x1xf32>,
      %c0_22 = arith.constant 0 : index
      %c0_23 = arith.constant 0 : index
      %24 = vector.load %arg7[%c0_22, %c0_23] : memref<8x128xf32, #tpu.memory_space<vmem>>, vector<8x128xf32>
      %cst_24 = arith.constant dense<0.000000e+00> : vector<8xf32>
      %25 = vector.multi_reduction <add>, %24, %cst_24 [1] : vector<8x128xf32> to vector<8xf32>
      %26 = vector.shape_cast %25 : vector<8xf32> to vector<8x1xf32>
      %cst_25 = arith.constant 3.906250e-03 : f32
      %27 = vector.broadcast %cst_25 : f32 to vector<8x1xf32>
      %28 = arith.mulf %26, %27 : vector<8x1xf32>
      %c0_26 = arith.constant 0 : index
      %c0_27 = arith.constant 0 : index
      %29 = vector.load %arg5[%c0_26, %c0_27] : memref<8x1xf32, #tpu.memory_space<vmem>>, vector<8x1xf32>
      tpu.vector_store %arg5[%c0_26, %c0_27], %28 {strides = array<i32>} : memref<8x1xf32, #tpu.memory_space<vmem>>, vector<8x1xf32>,
    } else {
    }
    return
  }
  func.func @transform_0(%arg0: i32, %arg1: i32) -> (i32, i32) {
    %c0_i32 = arith.constant 0 : i32
    return %arg0, %arg1 : i32, i32
  }
  func.func @transform_1(%arg0: i32, %arg1: i32) -> (i32, i32) {
    %c0_i32 = arith.constant 0 : i32
    return %arg0, %arg1 : i32, i32
  }
  func.func @transform_2(%arg0: i32, %arg1: i32) -> (i32, i32) {
    %c0_i32 = arith.constant 0 : i32
    %c0_i32_0 = arith.constant 0 : i32
    return %arg0, %c0_i32 : i32, i32
  }
  func.func @transform_3(%arg0: i32, %arg1: i32) -> (i32, i32) {
    %c0_i32 = arith.constant 0 : i32
    %c0_i32_0 = arith.constant 0 : i32
    return %arg0, %c0_i32 : i32, i32
  }
}

</mosaic_0001>

<bundles_post_ra>
// kernel: tpu_custom_call.1
= control target key start
LH: loop header
LB: loop body
LE: loop exit
PB: predicated region body
PF: predicated region fallthrough
CT: control target
= control target key end

     0   :  { %9 = vsyncpa [#allocation5], 0  ;;  %s171_s0 = inlined_call_operand.hbm [shape: f32[8,256], index: 0, kind: input, shape index: {}]   ;;  %s172_s1 = inlined_call_operand.hbm [shape: f32[8,256], index: 1, kind: input, shape index: {}]   ;;  %s173_s2 = inlined_call_operand.vmem [shape: f32[8,1], index: 2, kind: output, shape index: {0}]   ;;  %s174_s3 = inlined_call_operand.vmem [shape: f32[8,1], index: 3, kind: output, shape index: {1}]  }
   0x1   :  { %s16_s14 = sshll.u32 %s171_s0, 4  ;;  %s17_s14 = int_to_ptr.hbm [resolvable:$true] %s16_s14 }
   0x2   :  { %10 = vsyncpa [#allocation7], 0  ;;  %s137_s15 = smov [#allocation4]   ;;  %s27_s19 = sshll.u32 %s172_s1, 4  ;;  %s28_s19 = int_to_ptr.hbm [resolvable:$true] %s27_s19 }
   0x3   :  { %s18_s16 = sshll.u32 %s137_s15, 4  ;;  %s138_s20 = smov [#allocation6]   ;;  %s19_s16 = int_to_ptr.vmem [resolvable:$true] %s18_s16 }
   0x4   :  { %21 = dma.hbm_to_vmem [thread:$0]  %s17_s14, 256, %s19_s16, [#allocation5]  }
   0x5   :  { %s29_s21 = sshll.u32 %s138_s20, 4  ;;  %s30_s21 = int_to_ptr.vmem [resolvable:$true] %s29_s21 }
   0x6   :  { %32 = dma.hbm_to_vmem [thread:$0]  %s28_s19, 256, %s30_s21, [#allocation7]  }
   0x7   :  { %133 = dma.done.wait [#allocation5], 256  }
   0x8   :  { %134 = vsyncadd [#allocation5], 4294967040 }
   0x9   :  { %135 = dma.done.wait [#allocation7], 256  }
   0xa   :  { %136 = vsyncadd [#allocation7], 4294967040  ;;  %v49_v0 = vld [vmem:[#allocation4] sm:$0xff]  ;;  %v53_v1 = vld [vmem:[#allocation4 + $0x8] sm:$0xff]  ;;  %vm66_vm0 = vcmask 7168  }
   0xb   :  { %v55_v2 = vadd.f32 %v53_v1, %v49_v0  ;;  %v50_v3 = vld [vmem:[#allocation6] sm:$0xff]  ;;  %v54_v4 = vld [vmem:[#allocation6 + $0x8] sm:$0xff] }
   0xc   :  { %v56_v5 = vadd.f32 %v54_v4, %v50_v3 }
   0xd   :  { %63 = vadd.xlane.f32.xlu0 %v55_v2 }
  0x15   :  { %69 = vadd.xlane.f32.xlu0 %v56_v5 }
  0x80   :  { %v64_v6 = vpop.xlane.xlu0 %63 }
  0x81   :  { %v65_v7 = vmul.f32 0.00390625, %v64_v6 }
  0x83   :  { %67 = vst.msk [vmem:[%s173_s2] sm:$0xff] %vm66_vm0, %v65_v7 }
  0x88   :  { %v70_v8 = vpop.xlane.xlu0 %69 }
  0x89   :  { %v71_v9 = vmul.f32 0.00390625, %v70_v8 }
  0x8b   :  { %72 = vst.msk [vmem:[%s174_s3] sm:$0xff] %vm66_vm0, %v71_v9 }
  0x8c   :  { %81 = vsyncpa [#allocation5], 1 }
  0x8d   :  { %82 = vsyncpa [#allocation7], 1 }

</bundles_post_ra>
